<compile_context>
chip_gen: v5e
topology: v5e:2x2
jax: 0.10.0
libtpu: 0.0.40
codegen_flags: <defaults>
</compile_context>

<pallas_src>
import functools

import jax
import jax.numpy as jnp
import numpy as np
from jax.experimental import pallas as pl
from jax.experimental.pallas import tpu as pltpu


def _residual_block_kernel(x_ref, w_ref, b_ref, o_ref, col_ref, *,
                           kernel_size, dilation, nb):
    # x_ref  : (NB, Cp, TL)   NB batch elements per grid step, TL % 128 == 0
    # w_ref  : (Cp, K*Cp)     effective weight, w[o, k*Cp + c] = w_eff[o, c, k]
    #                         (compute dtype, e.g. bf16)
    # b_ref  : (Cp, 1)        bias (f32)
    # o_ref  : (NB, Cp, TL)   output
    # col_ref: (K*Cp, NB*TL)  im2col scratch in compute dtype (tap-major rows,
    #                         batch folded into the lane axis)
    K = kernel_size
    Cp = w_ref.shape[0]
    TL = x_ref.shape[2]
    P = (K - 1) * dilation  # causal left pad == amount chomped on the right

    # Zero only the constant causal-left-pad columns of each (tap, batch
    # segment). They depend only on the tap position, so they are shared by
    # conv1 and conv2 (a few lanes per tap instead of full-scratch zeroing).
    for k in range(K - 1):
        off = P - k * dilation  # > 0 for k < K-1
        for n in range(nb):
            col_ref[k * Cp:(k + 1) * Cp, n * TL:n * TL + off] = (
                jnp.zeros((Cp, off), col_ref.dtype))

    def matmul_bias_relu():
        # Single fused MXU matmul: (Cp, K*Cp) @ (K*Cp, NB*TL), f32 accumulation.
        acc = jnp.dot(w_ref[...], col_ref[...],
                      preferred_element_type=jnp.float32)
        return jnp.maximum(acc + b_ref[...], 0.0)  # bias + ReLU
        # TODO(synk): nn.Dropout is identity in eval mode; training-mode masks
        # are not generated here.

    # conv1: fill the data regions of col from x. Row block k holds the input
    # shifted right by off = P - k*dilation lanes (pure-left-pad == pad both
    # sides + chomp), per batch lane segment.
    for k in range(K):
        off = P - k * dilation
        for n in range(nb):
            col_ref[k * Cp:(k + 1) * Cp, n * TL + off:(n + 1) * TL] = (
                x_ref[n, :, :TL - off].astype(col_ref.dtype))

    # conv1 -> chomp -> relu -> dropout(id).
    h = matmul_bias_relu()  # (Cp, NB*TL), f32

    # conv2 (same weights) reads h: write h into the off==0 tap block
    # (k = K-1, which has no left-pad region), then fill the other K-1 taps as
    # shifted copies of that block. No separate h scratch needed.
    col_ref[(K - 1) * Cp:K * Cp, :] = h.astype(col_ref.dtype)
    for k in range(K - 1):
        off = P - k * dilation
        for n in range(nb):
            col_ref[k * Cp:(k + 1) * Cp, n * TL + off:(n + 1) * TL] = (
                col_ref[(K - 1) * Cp:K * Cp, n * TL:(n + 1) * TL - off])

    # conv2 -> chomp -> relu -> dropout(id).
    h2 = matmul_bias_relu()  # (Cp, NB*TL), f32

    # Residual add, one lane-dense (Cp, TL) store per batch segment.
    for n in range(nb):
        o_ref[n, :, :] = (h2[:, n * TL:(n + 1) * TL]
                          + x_ref[n].astype(jnp.float32)).astype(o_ref.dtype)


def residual_block_forward(x, w_eff, b, *, kernel_size, stride, dilation,
                           compute_dtype=jnp.bfloat16, batch_per_step=None):
    """x: (N, C, L); w_eff: (C, C, K) effective (weight-normed) weight; b: (C,).

    compute_dtype: MXU/im2col dtype. bf16 (default) uses the bf16-native MXU
    with f32 accumulation; jnp.float32 reproduces the PyTorch module exactly.
    """
    assert stride == 1, "TCN residual block requires stride=1 for the residual add"
    N, C, L = x.shape
    K = kernel_size
    assert w_eff.shape == (C, C, K)
    compute_dtype = jnp.dtype(compute_dtype)

    # Channel padding to the sublane multiple of the scratch dtype so every
    # tap row-block of col starts on a packed-row boundary.
    sub = 16 if compute_dtype.itemsize == 2 else 8
    Cp = max(sub, ((C + sub - 1) // sub) * sub)

    # Lane-dense time axis: right-pad L to a multiple of 128. Safe because the
    # conv is strictly causal (only looks left), so the zero tail never
    # affects positions < L.
    TL = ((max(L, 1) + 127) // 128) * 128

    # Pack several batch elements into one grid step (fold batch into the lane
    # axis of col) so the fused matmul sees >= ~512 lanes where possible.
    if batch_per_step is None:
        nb = min(N, max(1, 512 // TL))
    else:
        nb = max(1, min(N, int(batch_per_step)))
    # Keep the im2col scratch under ~16 MiB.
    while nb > 1 and K * Cp * nb * TL * compute_dtype.itemsize > (16 << 20):
        nb //= 2
    Np = ((N + nb - 1) // nb) * nb

    # Pad input: batch -> Np, channels -> Cp, time -> TL (all zeros; padded
    # rows/channels are sliced off at the end and never affect real outputs).
    x_p = jnp.pad(x, ((0, Np - N), (0, Cp - C), (0, TL - L)))

    # Weight layout for the fused im2col matmul: w2d[o, k*Cp + c] = w_eff[o, c, k],
    # zero-padded to (Cp, K*Cp).
    w_pad = jnp.pad(w_eff, ((0, Cp - C), (0, Cp - C), (0, 0)))
    w2d = jnp.transpose(w_pad, (0, 2, 1)).reshape(Cp, K * Cp).astype(compute_dtype)
    b2 = jnp.pad(b, (0, Cp - C)).reshape(Cp, 1).astype(jnp.float32)

    # VMEM budget: im2col scratch + double-buffered in/out blocks + weights.
    x_isz = jnp.dtype(x.dtype).itemsize
    col_bytes = K * Cp * nb * TL * compute_dtype.itemsize
    io_bytes = 2 * 2 * (nb * Cp * TL * x_isz)          # double-buffered in + out
    w_bytes = Cp * K * Cp * compute_dtype.itemsize + Cp * 4
    vmem_limit = min(64 << 20,
                     max(32 << 20, int(1.5 * (col_bytes + io_bytes + w_bytes))))

    # Advisory cost for XLA's scheduler: 2 convs of 2*K*Cp*Cp*TL flops each,
    # per batch element.
    flops = 4 * K * Cp * Cp * TL * Np
    bytes_accessed = (x_p.size * x_isz + Np * Cp * TL * x_isz
                      + w2d.size * compute_dtype.itemsize + b2.size * 4)

    kernel = functools.partial(_residual_block_kernel, kernel_size=K,
                               dilation=dilation, nb=nb)
    out = pl.pallas_call(
        kernel,
        out_shape=jax.ShapeDtypeStruct((Np, Cp, TL), x.dtype),
        grid=(Np // nb,),
        in_specs=[
            pl.BlockSpec((nb, Cp, TL), lambda g: (g, 0, 0)),
            pl.BlockSpec((Cp, K * Cp), lambda g: (0, 0)),
            pl.BlockSpec((Cp, 1), lambda g: (0, 0)),
        ],
        out_specs=pl.BlockSpec((nb, Cp, TL), lambda g: (g, 0, 0)),
        scratch_shapes=[
            pltpu.VMEM((K * Cp, nb * TL), compute_dtype),  # im2col scratch
        ],
        compiler_params=pltpu.CompilerParams(
            dimension_semantics=("parallel",),
            vmem_limit_bytes=vmem_limit),
        cost_estimate=pl.CostEstimate(flops=flops, transcendentals=0,
                                      bytes_accessed=bytes_accessed),
    )(x_p, w2d, b2)
    return out[:N, :C, :L]


def _reference_forward(x, w_eff, b, kernel_size, dilation, padding):
    """Pure-JAX reference matching the PyTorch module (eval mode)."""
    def conv_chomp_relu(inp):
        y = jax.lax.conv_general_dilated(
            inp, w_eff, window_strides=(1,), padding=[(padding, padding)],
            rhs_dilation=(dilation,), dimension_numbers=("NCH", "OIH", "NCH"))
        y = y[:, :, :inp.shape[2]]            # chomp the right padding
        return jnp.maximum(y + b[None, :, None], 0.0)
    return conv_chomp_relu(conv_chomp_relu(x)) + x


if __name__ == "__main__":
    # conv1 is conv2 (same nn.Module) in the reference, so n_inputs == n_outputs.
    N, C, L = 2, 4, 16
    kernel_size, stride, dilation = 3, 1, 2
    padding = (kernel_size - 1) * dilation

    key = jax.random.PRNGKey(0)
    kv, kg, kb, kx = jax.random.split(key, 4)

    # weight_norm parameters: v (direction), g (per-output-channel magnitude).
    v = jax.random.normal(kv, (C, C, kernel_size), jnp.float32) * 0.3
    g = jax.random.uniform(kg, (C,), jnp.float32, minval=0.5, maxval=1.5)
    bias = jax.random.normal(kb, (C,), jnp.float32) * 0.1
    v_norm = jnp.sqrt(jnp.sum(v * v, axis=(1, 2), keepdims=True))   # (C,1,1)
    w_eff = (g[:, None, None] * v / v_norm).astype(jnp.float32)     # effective weight

    x = jax.random.normal(kx, (N, C, L), jnp.float32)

    ref = _reference_forward(x, w_eff, bias, kernel_size, dilation, padding)

    # Default bf16 MXU path (f32 accumulation) — looser tolerance.
    out_bf16 = residual_block_forward(x, w_eff, bias, kernel_size=kernel_size,
                                      stride=stride, dilation=dilation)
    out_bf16 = jax.block_until_ready(out_bf16)
    assert out_bf16.shape == x.shape and out_bf16.dtype == x.dtype
    assert np.allclose(np.asarray(out_bf16), np.asarray(ref), rtol=1e-1, atol=1e-1), \
        "Pallas kernel (bf16 compute) does not match reference"

    # Exact f32 compute path (same semantics as the PyTorch module).
    out_f32 = residual_block_forward(x, w_eff, bias, kernel_size=kernel_size,
                                     stride=stride, dilation=dilation,
                                     compute_dtype=jnp.float32)
    out_f32 = jax.block_until_ready(out_f32)
    assert out_f32.shape == x.shape and out_f32.dtype == x.dtype
    assert np.allclose(np.asarray(out_f32), np.asarray(ref), rtol=1e-5, atol=1e-5), \
        "Pallas kernel (f32) does not match reference"

    print("KERNEL_OK")
</pallas_src>

<mosaic_0001>
module attributes {stable_mosaic.version = 11 : i64} {
  func.func @_residual_block_kernel(%arg0: i32, %arg1: memref<2x16x128xf32, #tpu.memory_space<vmem>>, %arg2: memref<16x48xbf16, #tpu.memory_space<vmem>>, %arg3: memref<16x1xf32, #tpu.memory_space<vmem>>, %arg4: memref<2x16x128xf32, #tpu.memory_space<vmem>>, %arg5: memref<48x256xbf16, #tpu.memory_space<vmem>>) attributes {dimension_semantics = [#tpu.dimension_semantics<parallel>], iteration_bounds = array<i64: 1>, scalar_prefetch = 0 : i64, scratch_operands = 1 : i64, tpu.core_type = #tpu.core_type<tc>, window_params = [{transform_indices = @transform_0, window_bounds = array<i64: 2, 16, 128>}, {pipeline_mode = #tpu.pipeline_mode<synchronous>, transform_indices = @transform_1, window_bounds = array<i64: 16, 48>}, {pipeline_mode = #tpu.pipeline_mode<synchronous>, transform_indices = @transform_2, window_bounds = array<i64: 16, 1>}, {transform_indices = @transform_3, window_bounds = array<i64: 2, 16, 128>}]} {
    %cst = arith.constant 0.000000e+00 : bf16
    %0 = vector.broadcast %cst : bf16 to vector<16x4xbf16>
    %c0 = arith.constant 0 : index
    %c0_0 = arith.constant 0 : index
    %1 = vector.load %arg5[%c0, %c0_0] : memref<48x256xbf16, #tpu.memory_space<vmem>>, vector<16x4xbf16>
    tpu.vector_store %arg5[%c0, %c0_0], %0 {strides = array<i32>} : memref<48x256xbf16, #tpu.memory_space<vmem>>, vector<16x4xbf16>,
    %cst_1 = arith.constant 0.000000e+00 : bf16
    %2 = vector.broadcast %cst_1 : bf16 to vector<16x4xbf16>
    %c0_2 = arith.constant 0 : index
    %c128 = arith.constant 128 : index
    %3 = vector.load %arg5[%c0_2, %c128] : memref<48x256xbf16, #tpu.memory_space<vmem>>, vector<16x4xbf16>
    tpu.vector_store %arg5[%c0_2, %c128], %2 {strides = array<i32>} : memref<48x256xbf16, #tpu.memory_space<vmem>>, vector<16x4xbf16>,
    %cst_3 = arith.constant 0.000000e+00 : bf16
    %4 = vector.broadcast %cst_3 : bf16 to vector<16x2xbf16>
    %c16 = arith.constant 16 : index
    %c0_4 = arith.constant 0 : index
    %5 = vector.load %arg5[%c16, %c0_4] : memref<48x256xbf16, #tpu.memory_space<vmem>>, vector<16x2xbf16>
    tpu.vector_store %arg5[%c16, %c0_4], %4 {strides = array<i32>} : memref<48x256xbf16, #tpu.memory_space<vmem>>, vector<16x2xbf16>,
    %cst_5 = arith.constant 0.000000e+00 : bf16
    %6 = vector.broadcast %cst_5 : bf16 to vector<16x2xbf16>
    %c16_6 = arith.constant 16 : index
    %c128_7 = arith.constant 128 : index
    %7 = vector.load %arg5[%c16_6, %c128_7] : memref<48x256xbf16, #tpu.memory_space<vmem>>, vector<16x2xbf16>
    tpu.vector_store %arg5[%c16_6, %c128_7], %6 {strides = array<i32>} : memref<48x256xbf16, #tpu.memory_space<vmem>>, vector<16x2xbf16>,
    %c0_8 = arith.constant 0 : index
    %c0_9 = arith.constant 0 : index
    %c0_10 = arith.constant 0 : index
    %8 = vector.load %arg1[%c0_8, %c0_9, %c0_10] : memref<2x16x128xf32, #tpu.memory_space<vmem>>, vector<1x16x124xf32>
    %9 = vector.shape_cast %8 : vector<1x16x124xf32> to vector<16x124xf32>
    %10 = arith.truncf %9 : vector<16x124xf32> to vector<16x124xbf16>
    %c0_11 = arith.constant 0 : index
    %c4 = arith.constant 4 : index
    %11 = vector.load %arg5[%c0_11, %c4] : memref<48x256xbf16, #tpu.memory_space<vmem>>, vector<16x124xbf16>
    tpu.vector_store %arg5[%c0_11, %c4], %10 {strides = array<i32>} : memref<48x256xbf16, #tpu.memory_space<vmem>>, vector<16x124xbf16>,
    %c1 = arith.constant 1 : index
    %c0_12 = arith.constant 0 : index
    %c0_13 = arith.constant 0 : index
    %12 = vector.load %arg1[%c1, %c0_12, %c0_13] : memref<2x16x128xf32, #tpu.memory_space<vmem>>, vector<1x16x124xf32>
    %13 = vector.shape_cast %12 : vector<1x16x124xf32> to vector<16x124xf32>
    %14 = arith.truncf %13 : vector<16x124xf32> to vector<16x124xbf16>
    %c0_14 = arith.constant 0 : index
    %c132 = arith.constant 132 : index
    %15 = vector.load %arg5[%c0_14, %c132] : memref<48x256xbf16, #tpu.memory_space<vmem>>, vector<16x124xbf16>
    tpu.vector_store %arg5[%c0_14, %c132], %14 {strides = array<i32>} : memref<48x256xbf16, #tpu.memory_space<vmem>>, vector<16x124xbf16>,
    %c0_15 = arith.constant 0 : index
    %c0_16 = arith.constant 0 : index
    %c0_17 = arith.constant 0 : index
    %16 = vector.load %arg1[%c0_15, %c0_16, %c0_17] : memref<2x16x128xf32, #tpu.memory_space<vmem>>, vector<1x16x126xf32>
    %17 = vector.shape_cast %16 : vector<1x16x126xf32> to vector<16x126xf32>
    %18 = arith.truncf %17 : vector<16x126xf32> to vector<16x126xbf16>
    %c16_18 = arith.constant 16 : index
    %c2 = arith.constant 2 : index
    %19 = vector.load %arg5[%c16_18, %c2] : memref<48x256xbf16, #tpu.memory_space<vmem>>, vector<16x126xbf16>
    tpu.vector_store %arg5[%c16_18, %c2], %18 {strides = array<i32>} : memref<48x256xbf16, #tpu.memory_space<vmem>>, vector<16x126xbf16>,
    %c1_19 = arith.constant 1 : index
    %c0_20 = arith.constant 0 : index
    %c0_21 = arith.constant 0 : index
    %20 = vector.load %arg1[%c1_19, %c0_20, %c0_21] : memref<2x16x128xf32, #tpu.memory_space<vmem>>, vector<1x16x126xf32>
    %21 = vector.shape_cast %20 : vector<1x16x126xf32> to vector<16x126xf32>
    %22 = arith.truncf %21 : vector<16x126xf32> to vector<16x126xbf16>
    %c16_22 = arith.constant 16 : index
    %c130 = arith.constant 130 : index
    %23 = vector.load %arg5[%c16_22, %c130] : memref<48x256xbf16, #tpu.memory_space<vmem>>, vector<16x126xbf16>
    tpu.vector_store %arg5[%c16_22, %c130], %22 {strides = array<i32>} : memref<48x256xbf16, #tpu.memory_space<vmem>>, vector<16x126xbf16>,
    %c0_23 = arith.constant 0 : index
    %c0_24 = arith.constant 0 : index
    %c0_25 = arith.constant 0 : index
    %24 = vector.load %arg1[%c0_23, %c0_24, %c0_25] : memref<2x16x128xf32, #tpu.memory_space<vmem>>, vector<1x16x128xf32>
    %25 = vector.shape_cast %24 : vector<1x16x128xf32> to vector<16x128xf32>
    %26 = arith.truncf %25 : vector<16x128xf32> to vector<16x128xbf16>
    %c32 = arith.constant 32 : index
    %c0_26 = arith.constant 0 : index
    %27 = vector.load %arg5[%c32, %c0_26] : memref<48x256xbf16, #tpu.memory_space<vmem>>, vector<16x128xbf16>
    tpu.vector_store %arg5[%c32, %c0_26], %26 {strides = array<i32>} : memref<48x256xbf16, #tpu.memory_space<vmem>>, vector<16x128xbf16>,
    %c1_27 = arith.constant 1 : index
    %c0_28 = arith.constant 0 : index
    %c0_29 = arith.constant 0 : index
    %28 = vector.load %arg1[%c1_27, %c0_28, %c0_29] : memref<2x16x128xf32, #tpu.memory_space<vmem>>, vector<1x16x128xf32>
    %29 = vector.shape_cast %28 : vector<1x16x128xf32> to vector<16x128xf32>
    %30 = arith.truncf %29 : vector<16x128xf32> to vector<16x128xbf16>
    %c32_30 = arith.constant 32 : index
    %c128_31 = arith.constant 128 : index
    %31 = vector.load %arg5[%c32_30, %c128_31] : memref<48x256xbf16, #tpu.memory_space<vmem>>, vector<16x128xbf16>
    tpu.vector_store %arg5[%c32_30, %c128_31], %30 {strides = array<i32>} : memref<48x256xbf16, #tpu.memory_space<vmem>>, vector<16x128xbf16>,
    %c0_32 = arith.constant 0 : index
    %c0_33 = arith.constant 0 : index
    %32 = vector.load %arg2[%c0_32, %c0_33] : memref<16x48xbf16, #tpu.memory_space<vmem>>, vector<16x48xbf16>
    %c0_34 = arith.constant 0 : index
    %c0_35 = arith.constant 0 : index
    %33 = vector.load %arg5[%c0_34, %c0_35] : memref<48x256xbf16, #tpu.memory_space<vmem>>, vector<48x256xbf16>
    %cst_36 = arith.constant dense<0.000000e+00> : vector<16x256xf32>
    %34 = tpu.matmul %32, %33, %cst_36 {dimension_numbers = #tpu.dot_dimension_numbers<[1], [0], [0], [1], [0, 0, 1, 1], [], []>} : vector<16x48xbf16>, vector<48x256xbf16>, vector<16x256xf32> -> vector<16x256xf32>
    %c0_37 = arith.constant 0 : index
    %c0_38 = arith.constant 0 : index
    %35 = vector.load %arg3[%c0_37, %c0_38] : memref<16x1xf32, #tpu.memory_space<vmem>>, vector<16x1xf32>
    %36 = vector.broadcast %35 : vector<16x1xf32> to vector<16x256xf32>
    %37 = arith.addf %34, %36 : vector<16x256xf32>
    %cst_39 = arith.constant 0.000000e+00 : f32
    %38 = vector.broadcast %cst_39 : f32 to vector<16x256xf32>
    %39 = arith.maximumf %37, %38 : vector<16x256xf32>
    %40 = arith.truncf %39 : vector<16x256xf32> to vector<16x256xbf16>
    %c32_40 = arith.constant 32 : index
    %c0_41 = arith.constant 0 : index
    %41 = vector.load %arg5[%c32_40, %c0_41] : memref<48x256xbf16, #tpu.memory_space<vmem>>, vector<16x256xbf16>
    tpu.vector_store %arg5[%c32_40, %c0_41], %40 {strides = array<i32>} : memref<48x256xbf16, #tpu.memory_space<vmem>>, vector<16x256xbf16>,
    %c32_42 = arith.constant 32 : index
    %c0_43 = arith.constant 0 : index
    %42 = vector.load %arg5[%c32_42, %c0_43] : memref<48x256xbf16, #tpu.memory_space<vmem>>, vector<16x124xbf16>
    %c0_44 = arith.constant 0 : index
    %c4_45 = arith.constant 4 : index
    %43 = vector.load %arg5[%c0_44, %c4_45] : memref<48x256xbf16, #tpu.memory_space<vmem>>, vector<16x124xbf16>
    tpu.vector_store %arg5[%c0_44, %c4_45], %42 {strides = array<i32>} : memref<48x256xbf16, #tpu.memory_space<vmem>>, vector<16x124xbf16>,
    %c32_46 = arith.constant 32 : index
    %c128_47 = arith.constant 128 : index
    %44 = vector.load %arg5[%c32_46, %c128_47] : memref<48x256xbf16, #tpu.memory_space<vmem>>, vector<16x124xbf16>
    %c0_48 = arith.constant 0 : index
    %c132_49 = arith.constant 132 : index
    %45 = vector.load %arg5[%c0_48, %c132_49] : memref<48x256xbf16, #tpu.memory_space<vmem>>, vector<16x124xbf16>
    tpu.vector_store %arg5[%c0_48, %c132_49], %44 {strides = array<i32>} : memref<48x256xbf16, #tpu.memory_space<vmem>>, vector<16x124xbf16>,
    %c32_50 = arith.constant 32 : index
    %c0_51 = arith.constant 0 : index
    %46 = vector.load %arg5[%c32_50, %c0_51] : memref<48x256xbf16, #tpu.memory_space<vmem>>, vector<16x126xbf16>
    %c16_52 = arith.constant 16 : index
    %c2_53 = arith.constant 2 : index
    %47 = vector.load %arg5[%c16_52, %c2_53] : memref<48x256xbf16, #tpu.memory_space<vmem>>, vector<16x126xbf16>
    tpu.vector_store %arg5[%c16_52, %c2_53], %46 {strides = array<i32>} : memref<48x256xbf16, #tpu.memory_space<vmem>>, vector<16x126xbf16>,
    %c32_54 = arith.constant 32 : index
    %c128_55 = arith.constant 128 : index
    %48 = vector.load %arg5[%c32_54, %c128_55] : memref<48x256xbf16, #tpu.memory_space<vmem>>, vector<16x126xbf16>
    %c16_56 = arith.constant 16 : index
    %c130_57 = arith.constant 130 : index
    %49 = vector.load %arg5[%c16_56, %c130_57] : memref<48x256xbf16, #tpu.memory_space<vmem>>, vector<16x126xbf16>
    tpu.vector_store %arg5[%c16_56, %c130_57], %48 {strides = array<i32>} : memref<48x256xbf16, #tpu.memory_space<vmem>>, vector<16x126xbf16>,
    %c0_58 = arith.constant 0 : index
    %c0_59 = arith.constant 0 : index
    %50 = vector.load %arg2[%c0_58, %c0_59] : memref<16x48xbf16, #tpu.memory_space<vmem>>, vector<16x48xbf16>
    %c0_60 = arith.constant 0 : index
    %c0_61 = arith.constant 0 : index
    %51 = vector.load %arg5[%c0_60, %c0_61] : memref<48x256xbf16, #tpu.memory_space<vmem>>, vector<48x256xbf16>
    %cst_62 = arith.constant dense<0.000000e+00> : vector<16x256xf32>
    %52 = tpu.matmul %50, %51, %cst_62 {dimension_numbers = #tpu.dot_dimension_numbers<[1], [0], [0], [1], [0, 0, 1, 1], [], []>} : vector<16x48xbf16>, vector<48x256xbf16>, vector<16x256xf32> -> vector<16x256xf32>
    %c0_63 = arith.constant 0 : index
    %c0_64 = arith.constant 0 : index
    %53 = vector.load %arg3[%c0_63, %c0_64] : memref<16x1xf32, #tpu.memory_space<vmem>>, vector<16x1xf32>
    %54 = vector.broadcast %53 : vector<16x1xf32> to vector<16x256xf32>
    %55 = arith.addf %52, %54 : vector<16x256xf32>
    %cst_65 = arith.constant 0.000000e+00 : f32
    %56 = vector.broadcast %cst_65 : f32 to vector<16x256xf32>
    %57 = arith.maximumf %55, %56 : vector<16x256xf32>
    %58 = vector.extract_strided_slice %57 {offsets = [0, 0], sizes = [16, 128], strides = [1, 1]} : vector<16x256xf32> to vector<16x128xf32>
    %c0_66 = arith.constant 0 : index
    %c0_67 = arith.constant 0 : index
    %c0_68 = arith.constant 0 : index
    %59 = vector.load %arg1[%c0_66, %c0_67, %c0_68] : memref<2x16x128xf32, #tpu.memory_space<vmem>>, vector<1x16x128xf32>
    %60 = vector.shape_cast %59 : vector<1x16x128xf32> to vector<16x128xf32>
    %61 = arith.addf %58, %60 : vector<16x128xf32>
    %c0_69 = arith.constant 0 : index
    %c0_70 = arith.constant 0 : index
    %c0_71 = arith.constant 0 : index
    %62 = vector.load %arg4[%c0_69, %c0_70, %c0_71] : memref<2x16x128xf32, #tpu.memory_space<vmem>>, vector<1x16x128xf32>
    %63 = vector.shape_cast %62 : vector<1x16x128xf32> to vector<16x128xf32>
    %64 = vector.shape_cast %61 : vector<16x128xf32> to vector<1x16x128xf32>
    tpu.vector_store %arg4[%c0_69, %c0_70, %c0_71], %64 {strides = array<i32>} : memref<2x16x128xf32, #tpu.memory_space<vmem>>, vector<1x16x128xf32>,
    %65 = vector.extract_strided_slice %57 {offsets = [0, 128], sizes = [16, 128], strides = [1, 1]} : vector<16x256xf32> to vector<16x128xf32>
    %c1_72 = arith.constant 1 : index
    %c0_73 = arith.constant 0 : index
    %c0_74 = arith.constant 0 : index
    %66 = vector.load %arg1[%c1_72, %c0_73, %c0_74] : memref<2x16x128xf32, #tpu.memory_space<vmem>>, vector<1x16x128xf32>
    %67 = vector.shape_cast %66 : vector<1x16x128xf32> to vector<16x128xf32>
    %68 = arith.addf %65, %67 : vector<16x128xf32>
    %c1_75 = arith.constant 1 : index
    %c0_76 = arith.constant 0 : index
    %c0_77 = arith.constant 0 : index
    %69 = vector.load %arg4[%c1_75, %c0_76, %c0_77] : memref<2x16x128xf32, #tpu.memory_space<vmem>>, vector<1x16x128xf32>
    %70 = vector.shape_cast %69 : vector<1x16x128xf32> to vector<16x128xf32>
    %71 = vector.shape_cast %68 : vector<16x128xf32> to vector<1x16x128xf32>
    tpu.vector_store %arg4[%c1_75, %c0_76, %c0_77], %71 {strides = array<i32>} : memref<2x16x128xf32, #tpu.memory_space<vmem>>, vector<1x16x128xf32>,
    return
  }
  func.func @transform_0(%arg0: i32) -> (i32, i32, i32) {
    %c0_i32 = arith.constant 0 : i32
    %c0_i32_0 = arith.constant 0 : i32
    %c0_i32_1 = arith.constant 0 : i32
    return %arg0, %c0_i32, %c0_i32_0 : i32, i32, i32
  }
  func.func @transform_1(%arg0: i32) -> (i32, i32) {
    %c0_i32 = arith.constant 0 : i32
    %c0_i32_0 = arith.constant 0 : i32
    %c0_i32_1 = arith.constant 0 : i32
    return %c0_i32, %c0_i32_0 : i32, i32
  }
  func.func @transform_2(%arg0: i32) -> (i32, i32) {
    %c0_i32 = arith.constant 0 : i32
    %c0_i32_0 = arith.constant 0 : i32
    %c0_i32_1 = arith.constant 0 : i32
    return %c0_i32, %c0_i32_0 : i32, i32
  }
  func.func @transform_3(%arg0: i32) -> (i32, i32, i32) {
    %c0_i32 = arith.constant 0 : i32
    %c0_i32_0 = arith.constant 0 : i32
    %c0_i32_1 = arith.constant 0 : i32
    return %arg0, %c0_i32, %c0_i32_0 : i32, i32, i32
  }
}

</mosaic_0001>

<bundles_post_ra>
// kernel: tpu_custom_call.1
= control target key start
LH: loop header
LB: loop body
LE: loop exit
PB: predicated region body
PF: predicated region fallthrough
CT: control target
= control target key end

     0   :  { %8 = vsyncpa [#allocation4], 0  ;;  %s629_s0 = inlined_call_operand.hbm [shape: f32[2,16,128], index: 0, kind: input, shape index: {}]   ;;  %s630_s1 = inlined_call_operand.vmem [shape: bf16[16,48], index: 1, kind: input, shape index: {}]   ;;  %s631_s2 = inlined_call_operand.vmem [shape: f32[16,1], index: 2, kind: input, shape index: {}]   ;;  %s632_s3 = inlined_call_operand.hbm [shape: f32[2,16,128], index: 3, kind: output, shape index: {}]  }
   0x1   :  { %9 = vsyncpa [#allocation5], 0  ;;  %s14_s14 = sshll.u32 %s629_s0, 4  ;;  %s514_s15 = smov [#allocation3]   ;;  %s15_s14 = int_to_ptr.hbm [resolvable:$true] %s14_s14 }
   0x2   :  { %s16_s16 = sshll.u32 %s514_s15, 4  ;;  %s515_s17 = smov 128   ;;  %s17_s16 = int_to_ptr.vmem [resolvable:$true] %s16_s16 }
   0x3   :  { %s516_s18 = smov 8  }
   0x4   :  { %22 = dma.hbm_to_vmem [thread:$0]  %s15_s14, 512, %s17_s16, [#allocation4], %s515_s17, %s515_s17, %s516_s18  }
   0x5   :  { %510 = dma.done.wait [#allocation4], 512  }
   0x6   :  { %511 = vsyncadd [#allocation4], 4294966784  ;;  %vm37_vm0 = vcmask 11264   ;;  %v517_v0 = vmov 0   ;;  %v547_v1 = vld [vmem:[#allocation3 + $0x10] sm:$0xff]  ;;  %v549_v2 = vld [vmem:[#allocation3] sm:$0xff] }
   0x7   :  { %40 = vst.msk [vmem:[#allocation2 + $0x14] sm:$0xf] %vm37_vm0, %v517_v0  ;;  %460 = vset.pattern.permute.xlu0 %v517_v0  ;;  %459 = vset.pattern.permute.xlu2 %v517_v0  ;;  %v89_v3 = vpack.c.bf16 %v547_v1, %v547_v1  ;;  %v74_v4 = vpack.c.bf16 %v549_v2, %v549_v2  ;;  %v555_v5 = vld [vmem:[#allocation3 + $0x18] sm:$0xff]  ;;  %v557_v6 = vld [vmem:[#allocation3 + $0x8] sm:$0xff]  ;;  %s518_s0 = smov 2   ;;  %s519_s19 = smov 4  }
   0x8   :  { %38 = vst.msk [vmem:[#allocation2 + $0x10] sm:$0xf] %vm37_vm0, %v517_v0  ;;  %461 = vset.pattern.permute.xlu1 %v517_v0  ;;  %v75_v7 = vpack.c.bf16 %v557_v6, %v557_v6  ;;  %v90_v8 = vpack.c.bf16 %v555_v5, %v555_v5  ;;  %vm32_vm1 = vcmask 27648   ;;  %vm54_vm2 = vcmask 1043488   ;;  %v576_v17 = vld [vmem:[%s631_s2 + $0x8] sm:$0xff]  ;;  %v581_v18 = vld [vmem:[%s631_s2] sm:$0xff] }
   0x9   :  { %39 = vst.msk [vmem:[#allocation2 + $0x18] sm:$0xf] %vm37_vm0, %v517_v0  ;;  %93 = vrot.lane.b32.xlu1 %v89_v3, %s518_s0  ;;  %78 = vrot.lane.b32.xlu0 %v74_v4, %s518_s0  ;;  %vm84_vm3 = vcmask 1043472   ;;  %v438_v34 = vld [vmem:[%s630_s1] sm:$0xff]  ;;  %vm168_vm4 = vcmask 392192   ;;  %s365_s30 = sshll.u32 %s632_s3, 4  ;;  %s366_s30 = int_to_ptr.hbm [resolvable:$true] %s365_s30 }
   0xa   :  { %41 = vst.msk [vmem:[#allocation2 + $0x1c] sm:$0xf] %vm37_vm0, %v517_v0  ;;  %48 = vrot.lane.b32.xlu2 %v74_v4, %s519_s19 }
   0xb   :  { %105 = vst [vmem:[#allocation2 + $0x20] sm:$0xf] %v74_v4 }
   0xc   :  { %106 = vst [vmem:[#allocation2 + $0x28] sm:$0xf] %v75_v7 }
   0xd   :  { %111 = vst [vmem:[#allocation2 + $0x24] sm:$0xf] %v89_v3 }
   0xe   :  { %112 = vst [vmem:[#allocation2 + $0x2c] sm:$0xf] %v90_v8 }
   0xf   :  { %33 = vst.msk [vmem:[#allocation2] sm:$0xf] %vm32_vm1, %v517_v0 }
  0x10   :  { %34 = vst.msk [vmem:[#allocation2 + $0x8] sm:$0xf] %vm32_vm1, %v517_v0 }
  0x11   :  { %95 = vrot.lane.b32.xlu1 %v90_v8, %s518_s0  ;;  %80 = vrot.lane.b32.xlu0 %v75_v7, %s518_s0  ;;  %35 = vst.msk [vmem:[#allocation2 + $0x4] sm:$0xf] %vm32_vm1, %v517_v0 }
  0x12   :  { %50 = vrot.lane.b32.xlu2 %v75_v7, %s519_s19  ;;  %36 = vst.msk [vmem:[#allocation2 + $0xc] sm:$0xf] %vm32_vm1, %v517_v0  ;;  %v400_v10 = vld [vmem:[#allocation2 + $0x20] sm:$0xf] }
  0x13   :  { %v444_v11 = vld [vmem:[#allocation2 + $0x24] sm:$0xf0] }
  0x14   :  { %v401_v12 = vor.u32 %v444_v11, %v400_v10  ;;  %v443_v13 = vld [vmem:[#allocation2 + $0x24] sm:$0xf] }
  0x15   :  { %v402_v14 = vld [vmem:[#allocation2 + $0x28] sm:$0xf0] }
  0x16   :  { %v405_v15 = vor.u32 %v443_v13, %v402_v14  ;;  %177 = vmatpush.bf16.msra.mxu0 %v401_v12 }
  0x18   :  { %191 = vmatpush.bf16.msra.mxu1 %v405_v15 }
  0x19   :  { %66 = vrot.lane.b32.xlu1 %v90_v8, %s519_s19  ;;  %64 = vrot.lane.b32.xlu0 %v89_v3, %s519_s19 }
  0x1a   :  { %125 = vperm.xlu2 %459, %v581_v18  }
  0x21   :  { %130 = vperm.xlu0 %460, %v576_v17  }
  0x64   :  { %v49_v9 = vpop.permute.xlu2 %48 }
  0x65   :  { %55 = vst.msk [vmem:[#allocation2] sm:$0xf] %vm54_vm2, %v49_v9 }
  0x6c   :  { %v51_v16 = vpop.permute.xlu2 %50  ;;  %v384_v31 = vld [vmem:[#allocation2] sm:$0xf] }
  0x6d   :  { %56 = vst.msk [vmem:[#allocation2 + $0x8] sm:$0xf] %vm54_vm2, %v51_v16 }
  0x74   :  { %v440_v32 = vld [vmem:[#allocation2 + $0x4] sm:$0xf0]  ;;  %v126_v38 = vpop.permute.xlu2 %125 }
  0x75   :  { %v385_v33 = vor.u32 %v440_v32, %v384_v31 }
  0x7b   :  { %v94_v19 = vpop.permute.xlu1 %93  ;;  %v79_v20 = vpop.permute.xlu0 %78 }
  0x7c   :  { %99 = vst.msk [vmem:[#allocation2 + $0x14] sm:$0xf] %vm84_vm3, %v94_v19 }
  0x7d   :  { %85 = vst.msk [vmem:[#allocation2 + $0x10] sm:$0xf] %vm84_vm3, %v79_v20 }
  0x83   :  { %v96_v21 = vpop.permute.xlu1 %95  ;;  %v81_v22 = vpop.permute.xlu0 %80  ;;  %v441_v25 = vld [vmem:[#allocation2 + $0x14] sm:$0xf] }
  0x84   :  { %100 = vst.msk [vmem:[#allocation2 + $0x1c] sm:$0xf] %vm84_vm3, %v96_v21  ;;  %v392_v27 = vld [vmem:[#allocation2 + $0x10] sm:$0xf] }
  0x85   :  { %86 = vst.msk [vmem:[#allocation2 + $0x18] sm:$0xf] %vm84_vm3, %v81_v22 }
  0x8b   :  { %v67_v23 = vpop.permute.xlu1 %66  ;;  %v65_v24 = vpop.permute.xlu0 %64  ;;  %v394_v26 = vld [vmem:[#allocation2 + $0x18] sm:$0xf0] }
  0x8c   :  { %71 = vst.msk [vmem:[#allocation2 + $0xc] sm:$0xf] %vm54_vm2, %v67_v23  ;;  %v442_v28 = vld [vmem:[#allocation2 + $0x14] sm:$0xf0]  ;;  %v397_v29 = vor.u32 %v441_v25, %v394_v26  ;;  %v445_v25 = vld [vmem:[%s630_s1] sm:$0xff]  ;;  %s520_s1 = smov [#allocation6]  }
  0x8d   :  { %70 = vst.msk [vmem:[#allocation2 + $0x4] sm:$0xf] %vm54_vm2, %v65_v24  ;;  %v393_v30 = vor.u32 %v442_v28, %v392_v27  ;;  %s363_s27 = sshll.u32 %s520_s1, 4  ;;  %s364_s27 = int_to_ptr.vmem [resolvable:$true] %s363_s27 }
  0x8e   :  { %192 = vmatpush.bf16.msra.mxu1 %v397_v29 }
  0x8f   :  { %178 = vmatpush.bf16.msra.mxu0 %v393_v30 }
  0x93   :  { %179 = vmatpush.bf16.msra.mxu0 %v385_v33  ;;  %v386_v35 = vld [vmem:[#allocation2 + $0x8] sm:$0xf0]  ;;  %v131_v45 = vpop.permute.xlu0 %130 }
  0x94   :  { %v439_v36 = vld [vmem:[#allocation2 + $0x4] sm:$0xf] }
  0x95   :  { %v389_v37 = vor.u32 %v439_v36, %v386_v35 }
  0x96   :  { %406 = vmatmul.msk.bf16.vlgmr.msra.gmra.mxu0 %vm168_vm4, %v438_v34 }
  0x97   :  { %193 = vmatpush.bf16.msra.mxu1 %v389_v37 }
  0x9a   :  { %407 = vmatmul.msk.bf16.vlgmr.msra.gmra.mxu1 %vm168_vm4, %v438_v34 }
 0x113   :  { %v181_v39 = vpop.f32.mrf.mxu0 }
 0x114   :  { %v182_v40 = vadd.f32 %v181_v39, %v126_v38 }
 0x116   :  { %v200_v42 = vmax.f32 %v182_v40, 0.0 }
 0x117   :  { %v195_v41 = vpop.f32.mrf.mxu1 }
 0x118   :  { %v196_v43 = vadd.f32 %v195_v41, %v126_v38 }
 0x11a   :  { %v201_v44 = vmax.f32 %v196_v43, 0.0 }
 0x11b   :  { %v183_v46 = vpop.f32.mrf.mxu0 }
 0x11c   :  { %v204_v47 = vpack.c.bf16 %v201_v44, %v200_v42  ;;  %v184_v48 = vadd.f32 %v183_v46, %v131_v45 }
 0x11e   :  { %206 = vst [vmem:[#allocation2 + $0x20] sm:$0xff] %v204_v47  ;;  %v202_v51 = vmax.f32 %v184_v48, 0.0 }
 0x11f   :  { %v197_v49 = vpop.f32.mrf.mxu1 }
 0x120   :  { %v198_v50 = vadd.f32 %v197_v49, %v131_v45 }
 0x122   :  { %v203_v52 = vmax.f32 %v198_v50, 0.0 }
 0x124   :  { %v205_v53 = vpack.c.bf16 %v203_v52, %v202_v51 }
 0x125   :  { %v232_v54 = vld [vmem:[#allocation2 + $0x20] sm:$0xf]  ;;  %v244_v56 = vld [vmem:[#allocation2 + $0x24] sm:$0xf] }
 0x126   :  { %v208_v55 = vld [vmem:[#allocation2 + $0x20] sm:$0xf]  ;;  %207 = vst [vmem:[#allocation2 + $0x28] sm:$0xff] %v205_v53  ;;  %236 = vrot.lane.b32.xlu1 %v232_v54, %s518_s0  ;;  %v450_v62 = vld [vmem:[#allocation2 + $0x24] sm:$0xf] }
 0x127   :  { %212 = vrot.lane.b32.xlu0 %v208_v55, %s519_s19  ;;  %v430_v57 = vld [vmem:[#allocation2 + $0x20] sm:$0xf]  ;;  %v220_v7 = vld [vmem:[#allocation2 + $0x24] sm:$0xf] }
 0x12d   :  { %v233_v58 = vld [vmem:[#allocation2 + $0x28] sm:$0xf]  ;;  %v221_v59 = vld [vmem:[#allocation2 + $0x2c] sm:$0xf] }
 0x12e   :  { %v451_v60 = vld [vmem:[#allocation2 + $0x24] sm:$0xf0]  ;;  %238 = vrot.lane.b32.xlu2 %v233_v58, %s518_s0  ;;  %248 = vrot.lane.b32.xlu1 %v244_v56, %s518_s0  ;;  %v432_v63 = vld [vmem:[#allocation2 + $0x28] sm:$0xf0] }
 0x12f   :  { %v431_v61 = vor.u32 %v451_v60, %v430_v57  ;;  %226 = vrot.lane.b32.xlu0 %v221_v59, %s519_s19  ;;  %v435_v0 = vor.u32 %v450_v62, %v432_v63  ;;  %v245_v3 = vld [vmem:[#allocation2 + $0x2c] sm:$0xf]  ;;  %v209_v4 = vld [vmem:[#allocation2 + $0x28] sm:$0xf] }
 0x131   :  { %319 = vmatpush.bf16.msra.mxu2 %v431_v61  ;;  %333 = vmatpush.bf16.msra.mxu3 %v435_v0 }
 0x136   :  { %250 = vrot.lane.b32.xlu2 %v245_v3, %s518_s0  ;;  %214 = vrot.lane.b32.xlu1 %v209_v4, %s519_s19 }
 0x13e   :  { %224 = vrot.lane.b32.xlu2 %v220_v7, %s519_s19  ;;  %268 = vperm.xlu1 %461, %v581_v18  }
 0x146   :  { %273 = vperm.xlu2 %459, %v576_v17  }
 0x188   :  { %v239_v8 = vpop.permute.xlu2 %238 }
 0x189   :  { %243 = vst.msk [vmem:[#allocation2 + $0x18] sm:$0xf] %vm84_vm3, %v239_v8 }
 0x190   :  { %v251_v9 = vpop.permute.xlu2 %250  ;;  %v449_v15 = vld [vmem:[#allocation2 + $0x14] sm:$0xf0] }
 0x191   :  { %255 = vst.msk [vmem:[#allocation2 + $0x1c] sm:$0xf] %vm84_vm3, %v251_v9 }
 0x198   :  { %v237_v10 = vpop.permute.xlu1 %236  ;;  %v225_v11 = vpop.permute.xlu2 %224  ;;  %v424_v20 = vld [vmem:[#allocation2 + $0x18] sm:$0xf0] }
 0x199   :  { %242 = vst.msk [vmem:[#allocation2 + $0x10] sm:$0xf] %vm84_vm3, %v237_v10  ;;  %v213_v12 = vpop.permute.xlu0 %212 }
 0x19a   :  { %230 = vst.msk [vmem:[#allocation2 + $0x4] sm:$0xf] %vm54_vm2, %v225_v11 }
 0x19b   :  { %218 = vst.msk [vmem:[#allocation2] sm:$0xf] %vm54_vm2, %v213_v12 }
 0x1a0   :  { %v249_v13 = vpop.permute.xlu1 %248  ;;  %v422_v14 = vld [vmem:[#allocation2 + $0x10] sm:$0xf]  ;;  %v274_v37 = vpop.permute.xlu2 %273 }
 0x1a1   :  { %254 = vst.msk [vmem:[#allocation2 + $0x14] sm:$0xf] %vm84_vm3, %v249_v13  ;;  %v227_v16 = vpop.permute.xlu0 %226  ;;  %v423_v17 = vor.u32 %v449_v15, %v422_v14  ;;  %v446_v23 = vld [vmem:[#allocation2 + $0x4] sm:$0xf] }
 0x1a2   :  { %231 = vst.msk [vmem:[#allocation2 + $0xc] sm:$0xf] %vm54_vm2, %v227_v16  ;;  %v414_v26 = vld [vmem:[#allocation2] sm:$0xf] }
 0x1a3   :  { %320 = vmatpush.bf16.msra.mxu2 %v423_v17 }
 0x1a8   :  { %v215_v18 = vpop.permute.xlu1 %214  ;;  %v448_v19 = vld [vmem:[#allocation2 + $0x14] sm:$0xf] }
 0x1a9   :  { %219 = vst.msk [vmem:[#allocation2 + $0x8] sm:$0xf] %vm54_vm2, %v215_v18  ;;  %v427_v21 = vor.u32 %v448_v19, %v424_v20  ;;  %v416_v22 = vld [vmem:[#allocation2 + $0x8] sm:$0xf0] }
 0x1aa   :  { %v419_v24 = vor.u32 %v446_v23, %v416_v22 }
 0x1ab   :  { %334 = vmatpush.bf16.msra.mxu3 %v427_v21 }
 0x1af   :  { %335 = vmatpush.bf16.msra.mxu3 %v419_v24 }
 0x1b0   :  { %v447_v27 = vld [vmem:[#allocation2 + $0x4] sm:$0xf0]  ;;  %v269_v29 = vpop.permute.xlu1 %268 }
 0x1b1   :  { %v415_v28 = vor.u32 %v447_v27, %v414_v26 }
 0x1b2   :  { %437 = vmatmul.msk.bf16.vlgmr.msra.gmra.mxu3 %vm168_vm4, %v445_v25 }
 0x1b3   :  { %321 = vmatpush.bf16.msra.mxu2 %v415_v28 }
 0x1b6   :  { %436 = vmatmul.msk.bf16.vlgmr.msra.gmra.mxu2 %vm168_vm4, %v445_v25 }
 0x235   :  { %v337_v30 = vpop.f32.mrf.mxu3 }
 0x236   :  { %v338_v31 = vadd.f32 %v337_v30, %v269_v29 }
 0x238   :  { %v343_v32 = vmax.f32 %v338_v31, 0.0 }
 0x239   :  { %v323_v33 = vpop.f32.mrf.mxu2 }
 0x23a   :  { %v354_v34 = vadd.f32 %v343_v32, %v547_v1  ;;  %v324_v35 = vadd.f32 %v323_v33, %v269_v29 }
 0x23c   :  { %357 = vst [vmem:[#allocation6 + $0x10] sm:$0xff] %v354_v34  ;;  %v342_v36 = vmax.f32 %v324_v35, 0.0 }
 0x23d   :  { %v339_v38 = vpop.f32.mrf.mxu3 }
 0x23e   :  { %v348_v39 = vadd.f32 %v342_v36, %v549_v2  ;;  %v340_v40 = vadd.f32 %v339_v38, %v274_v37 }
 0x240   :  { %350 = vst [vmem:[#allocation6] sm:$0xff] %v348_v39  ;;  %v345_v41 = vmax.f32 %v340_v40, 0.0 }
 0x241   :  { %v325_v42 = vpop.f32.mrf.mxu2 }
 0x242   :  { %v355_v43 = vadd.f32 %v345_v41, %v555_v5  ;;  %v326_v44 = vadd.f32 %v325_v42, %v274_v37 }
 0x244   :  { %358 = vst [vmem:[#allocation6 + $0x18] sm:$0xff] %v355_v43  ;;  %v344_v1 = vmax.f32 %v326_v44, 0.0 }
 0x246   :  { %v349_v45 = vadd.f32 %v344_v1, %v557_v6 }
 0x248   :  { %351 = vst [vmem:[#allocation6 + $0x8] sm:$0xff] %v349_v45 }
 0x249   :  { %371 = dma.vmem_to_hbm [thread:$0]  %s364_s27, 512, %s366_s30, [#allocation5], %s515_s17, %s515_s17, %s516_s18  }
 0x24a   :  { %512 = dma.done.wait [#allocation5], 512  }
 0x24b   :  { %513 = vsyncadd [#allocation5], 4294966784 }
 0x24c   :  { %376 = vsyncpa [#allocation4], 1 }
 0x24d   :  { %377 = vsyncpa [#allocation5], 1 }

</bundles_post_ra>
